<compile_context>
chip_gen: v7x
topology: tpu7x:2x2x1
jax: 0.10.0
libtpu: 0.0.40
codegen_flags: <defaults>
</compile_context>

<pallas_src>
import jax
import jax.numpy as jnp
from jax import lax
from jax.experimental import pallas as pl
from jax.experimental.pallas import tpu as pltpu

EPS = 1e-5
NEG_SLOPE = 0.2


def _tpu_budget():
    """Per-generation VMEM limit + max M tile (v5e/v6e: 128 MiB VMEM, v7x: 64 MiB/TC)."""
    cap = 64 * 1024 * 1024
    try:
        cap = int(pltpu.get_tpu_info().vmem_capacity_bytes)
    except Exception:
        pass  # fall back to the most conservative (v7x per-TC) budget
    vmem_limit = min(int(cap * 3 // 4), 112 * 1024 * 1024)   # 96 MiB on v5e/v6e, 48 on v7x
    max_tm = 1024 if cap >= (96 << 20) else 512
    return vmem_limit, max_tm


_VMEM_LIMIT, _MAX_TM = _tpu_budget()


# --------------------------------------------------------------------------------------
# Kernels
# --------------------------------------------------------------------------------------
def _conv_stats_kernel(p_ref, w_ref, conv_ref, sum_ref, ssq_ref):
    """Pass 1: conv-as-matmul with fully resident weights + per-M-tile BN statistics.

    p_ref:    (tm, kdim)       bf16 im2col patch tile (streamed)
    w_ref:    (kdim, cout_pad) bf16 reshaped conv weights (constant block -> DMA'd once)
    conv_ref: (tm, cout_pad)   bf16 conv output tile
    sum_ref:  (1, 1, cout_pad) f32 per-M-tile channel sum
    ssq_ref:  (1, 1, cout_pad) f32 per-M-tile channel sum of squares
    """
    acc = jnp.dot(p_ref[...], w_ref[...], preferred_element_type=jnp.float32)
    conv_ref[...] = acc.astype(conv_ref.dtype)                       # bf16 intermediate
    sum_ref[...] = jnp.sum(acc, axis=0, keepdims=True).reshape(sum_ref.shape)
    ssq_ref[...] = jnp.sum(acc * acc, axis=0, keepdims=True).reshape(ssq_ref.shape)


def _bn_lrelu_kernel(conv_ref, scale_ref, shift_ref, o_ref):
    """Pass 2: y = conv * scale + shift (folded BatchNorm), then LeakyReLU(0.2)."""
    y = conv_ref[...].astype(jnp.float32) * scale_ref[...] + shift_ref[...]
    o_ref[...] = jnp.where(y >= 0, y, NEG_SLOPE * y).astype(o_ref.dtype)


# --------------------------------------------------------------------------------------
# Wrapper helpers
# --------------------------------------------------------------------------------------
def _im2col_nhwc(x_nhwc, k=4, s=2, p=1):
    """kxk stride-s patches (pad p). Feature ordering: (kh, kw, cin), cin fastest."""
    n, h, w, c = x_nhwc.shape
    ho = (h + 2 * p - k) // s + 1
    wo = (w + 2 * p - k) // s + 1
    xp = jnp.pad(x_nhwc, ((0, 0), (p, p), (p, p), (0, 0)))
    cols = []
    for kh in range(k):
        for kw in range(k):
            cols.append(xp[:, kh:kh + s * ho:s, kw:kw + s * wo:s, :])   # [N,Ho,Wo,C]
    patches = jnp.stack(cols, axis=3)                                   # [N,Ho,Wo,k*k,C]
    return patches.reshape(n * ho * wo, k * k * c), ho, wo


def _round_up(x, m):
    return (x + m - 1) // m * m


def _pick_tm(m, max_tm):
    tm = max_tm
    while tm > 16 and tm >= m:   # keep >= 2 M tiles so the "parallel" axis can shard (v7x)
        tm //= 2
    return tm


# --------------------------------------------------------------------------------------
# Forward pass (NHWC, chainable) and NCHW parity wrapper
# --------------------------------------------------------------------------------------
def _unet_down_nhwc(x_nhwc, conv_w_oihw, gamma, beta, out_dtype=jnp.bfloat16):
    """UNetDown forward on NHWC input, returns NHWC (default bf16 for chaining)."""
    n, h, w, cin = x_nhwc.shape
    cout = conv_w_oihw.shape[0]
    cout_pad = _round_up(max(cout, 128), 128)

    x_bf16 = x_nhwc.astype(jnp.bfloat16)
    # TODO(synk): im2col still materializes a ~4x-expanded bf16 copy of the input in HBM;
    # removing it needs a manual-DMA (pl.ANY) halo / tap-reduction pass, since BlockSpec
    # tiles cannot express the overlapping (kh,kw) windows of a stride-2, k=4 conv.
    patches, ho, wo = _im2col_nhwc(x_bf16)                               # [M, K] bf16
    m, kdim = patches.shape

    # Weights [Cout, Cin, kh, kw] -> (kh, kw, cin) x Cout_pad (zero-padded, lane-dense).
    w_mat = jnp.transpose(conv_w_oihw.astype(jnp.float32), (2, 3, 1, 0)).reshape(kdim, cout)
    w_mat = jnp.pad(w_mat, ((0, 0), (0, cout_pad - cout))).astype(jnp.bfloat16)
    # TODO(synk): no K-tiled fallback is provided — the resident weight block is <= 8 MiB
    # bf16 for every UNetDown layer (Cin, Cout <= 512).

    gamma_p = jnp.pad(gamma.astype(jnp.float32), (0, cout_pad - cout)).reshape(1, cout_pad)
    beta_p = jnp.pad(beta.astype(jnp.float32), (0, cout_pad - cout)).reshape(1, cout_pad)

    tm = _pick_tm(m, _MAX_TM)
    m_pad = _round_up(m, tm)
    num_m = m_pad // tm
    if m_pad != m:
        # Zero rows contribute 0 to sum/ssq (stats divide by the true m) and are sliced off.
        patches = jnp.pad(patches, ((0, m_pad - m), (0, 0)))

    patch_kwargs = {}
    if num_m >= 4:                      # deeper buffering only when the M sweep is long
        patch_kwargs["pipeline_mode"] = pl.Buffered(3)
    patch_spec = pl.BlockSpec((tm, kdim), lambda i: (i, 0), **patch_kwargs)

    # ---- Pass 1: matmul (weights resident) + per-M-tile channel sum / sum-of-squares ----
    conv, tile_sum, tile_ssq = pl.pallas_call(
        _conv_stats_kernel,
        out_shape=(
            jax.ShapeDtypeStruct((m_pad, cout_pad), jnp.bfloat16),
            jax.ShapeDtypeStruct((num_m, 1, cout_pad), jnp.float32),
            jax.ShapeDtypeStruct((num_m, 1, cout_pad), jnp.float32),
        ),
        grid_spec=pltpu.PrefetchScalarGridSpec(
            num_scalar_prefetch=0,
            grid=(num_m,),
            in_specs=[
                patch_spec,                                          # streamed patches
                pl.BlockSpec((kdim, cout_pad), lambda i: (0, 0)),    # resident weights
            ],
            out_specs=(
                pl.BlockSpec((tm, cout_pad), lambda i: (i, 0)),
                pl.BlockSpec((1, 1, cout_pad), lambda i: (i, 0, 0)),
                pl.BlockSpec((1, 1, cout_pad), lambda i: (i, 0, 0)),
            ),
        ),
        compiler_params=pltpu.CompilerParams(
            dimension_semantics=("parallel",),
            vmem_limit_bytes=_VMEM_LIMIT,
        ),
    )(patches, w_mat)

    # ---- Tiny XLA reduce over M tiles -> folded per-channel scale / shift ---------------
    total = jnp.sum(tile_sum, axis=0)                        # [1, cout_pad]
    total_sq = jnp.sum(tile_ssq, axis=0)                     # [1, cout_pad]
    mean = total / m                                          # true m, not m_pad
    # E[x^2]-E[x]^2 in f32, guarded against negative round-off (biased batch variance).
    var = jnp.maximum(total_sq / m - mean * mean, 0.0)
    scale = gamma_p * lax.rsqrt(var + EPS)
    shift = beta_p - mean * scale

    # ---- Pass 2: elementwise BN (single FMA) + LeakyReLU over M tiles --------------------
    out_flat = pl.pallas_call(
        _bn_lrelu_kernel,
        out_shape=jax.ShapeDtypeStruct((m_pad, cout_pad), out_dtype),
        grid_spec=pltpu.PrefetchScalarGridSpec(
            num_scalar_prefetch=0,
            grid=(num_m,),
            in_specs=[
                pl.BlockSpec((tm, cout_pad), lambda i: (i, 0)),
                pl.BlockSpec((1, cout_pad), lambda i: (0, 0)),
                pl.BlockSpec((1, cout_pad), lambda i: (0, 0)),
            ],
            out_specs=pl.BlockSpec((tm, cout_pad), lambda i: (i, 0)),
        ),
        compiler_params=pltpu.CompilerParams(
            dimension_semantics=("parallel",),
            vmem_limit_bytes=_VMEM_LIMIT,
        ),
    )(conv, scale, shift)

    return out_flat[:m, :cout].reshape(n, ho, wo, cout)


unet_down_nhwc = jax.jit(_unet_down_nhwc, static_argnames=("out_dtype",))


def _unet_down_nchw(x_nchw, conv_w_oihw, gamma, beta):
    """PyTorch-parity wrapper: NCHW f32 in / NCHW f32 out (transposes only live here)."""
    x_nhwc = jnp.transpose(x_nchw, (0, 2, 3, 1))
    y = _unet_down_nhwc(x_nhwc, conv_w_oihw, gamma, beta, out_dtype=jnp.float32)
    return jnp.transpose(y, (0, 3, 1, 2))


unet_down = jax.jit(_unet_down_nchw)


# --------------------------------------------------------------------------------------
# Pure-JAX reference of the PyTorch forward (training-mode BatchNorm)
# --------------------------------------------------------------------------------------
def _reference(x_nchw, conv_w_oihw, gamma, beta):
    conv = lax.conv_general_dilated(
        x_nchw.astype(jnp.float32),
        conv_w_oihw.astype(jnp.float32),
        window_strides=(2, 2),
        padding=((1, 1), (1, 1)),
        dimension_numbers=("NCHW", "OIHW", "NCHW"),
    )
    mean = jnp.mean(conv, axis=(0, 2, 3), keepdims=True)
    var = jnp.mean((conv - mean) ** 2, axis=(0, 2, 3), keepdims=True)
    y = (conv - mean) * lax.rsqrt(var + EPS)
    y = y * gamma.reshape(1, -1, 1, 1) + beta.reshape(1, -1, 1, 1)
    return jnp.where(y >= 0, y, NEG_SLOPE * y)


if __name__ == "__main__":
    key = jax.random.PRNGKey(0)
    k_x, k_w, k_g, k_b = jax.random.split(key, 4)

    N, CIN, COUT, H, W = 2, 4, 8, 16, 16

    x = jax.random.normal(k_x, (N, CIN, H, W), dtype=jnp.float32)
    fan_in = CIN * 4 * 4
    conv_w = jax.random.normal(k_w, (COUT, CIN, 4, 4), dtype=jnp.float32) / jnp.sqrt(fan_in)
    gamma = 1.0 + 0.1 * jax.random.normal(k_g, (COUT,), dtype=jnp.float32)
    beta = 0.1 * jax.random.normal(k_b, (COUT,), dtype=jnp.float32)

    # The kernel feeds the MXU bf16 and keeps a bf16 conv intermediate; pre-quantize the
    # conv inputs so the f32 reference differs only by accumulation/intermediate rounding.
    x = x.astype(jnp.bfloat16).astype(jnp.float32)
    conv_w = conv_w.astype(jnp.bfloat16).astype(jnp.float32)

    out = jax.block_until_ready(unet_down(x, conv_w, gamma, beta))
    ref = jax.block_until_ready(_reference(x, conv_w, gamma, beta))

    assert out.shape == (N, COUT, H // 2, W // 2), out.shape
    max_err = float(jnp.max(jnp.abs(out - ref)))
    # bf16 conv intermediate => |err| ~ O(2^-9 * |conv| * scale); 3e-2 leaves ample margin.
    assert jnp.allclose(out, ref, atol=3e-2, rtol=3e-2), max_err

    # Chainable NHWC / bf16 entry point (no layout transposes, bf16 output store).
    out_nhwc = jax.block_until_ready(
        unet_down_nhwc(jnp.transpose(x, (0, 2, 3, 1)), conv_w, gamma, beta))
    assert out_nhwc.shape == (N, H // 2, W // 2, COUT), out_nhwc.shape
    assert out_nhwc.dtype == jnp.bfloat16
    assert bool(jnp.all(jnp.isfinite(out_nhwc.astype(jnp.float32))))

    # TODO(synk): BatchNorm running_mean/running_var buffer updates (training-side state
    # mutation) are not modeled; only the forward output is reproduced.
    print("KERNEL_OK")
</pallas_src>

<mosaic_0001>
module attributes {stable_mosaic.version = 11 : i64} {
  func.func @_conv_stats_kernel(%arg0: i32, %arg1: memref<64x64xbf16, #tpu.memory_space<vmem>>, %arg2: memref<64x128xbf16, #tpu.memory_space<vmem>>, %arg3: memref<64x128xbf16, #tpu.memory_space<vmem>>, %arg4: memref<1x1x128xf32, #tpu.memory_space<vmem>>, %arg5: memref<1x1x128xf32, #tpu.memory_space<vmem>>) attributes {dimension_semantics = [#tpu.dimension_semantics<parallel>], iteration_bounds = array<i64: 2>, scalar_prefetch = 0 : i64, scratch_operands = 0 : i64, tpu.core_type = #tpu.core_type<tc>, window_params = [{transform_indices = @transform_0, window_bounds = array<i64: 64, 64>}, {pipeline_mode = #tpu.pipeline_mode<synchronous>, transform_indices = @transform_1, window_bounds = array<i64: 64, 128>}, {transform_indices = @transform_2, window_bounds = array<i64: 64, 128>}, {transform_indices = @transform_3, window_bounds = array<i64: 1, 1, 128>}, {transform_indices = @transform_4, window_bounds = array<i64: 1, 1, 128>}]} {
    %c0 = arith.constant 0 : index
    %c0_0 = arith.constant 0 : index
    %0 = vector.load %arg1[%c0, %c0_0] : memref<64x64xbf16, #tpu.memory_space<vmem>>, vector<64x64xbf16>
    %c0_1 = arith.constant 0 : index
    %c0_2 = arith.constant 0 : index
    %1 = vector.load %arg2[%c0_1, %c0_2] : memref<64x128xbf16, #tpu.memory_space<vmem>>, vector<64x128xbf16>
    %cst = arith.constant dense<0.000000e+00> : vector<64x128xf32>
    %2 = tpu.matmul %0, %1, %cst {dimension_numbers = #tpu.dot_dimension_numbers<[1], [0], [0], [1], [0, 0, 1, 1], [], []>} : vector<64x64xbf16>, vector<64x128xbf16>, vector<64x128xf32> -> vector<64x128xf32>
    %3 = arith.truncf %2 : vector<64x128xf32> to vector<64x128xbf16>
    %c0_3 = arith.constant 0 : index
    %c0_4 = arith.constant 0 : index
    %4 = vector.load %arg3[%c0_3, %c0_4] : memref<64x128xbf16, #tpu.memory_space<vmem>>, vector<64x128xbf16>
    tpu.vector_store %arg3[%c0_3, %c0_4], %3 {strides = array<i32>} : memref<64x128xbf16, #tpu.memory_space<vmem>>, vector<64x128xbf16>,
    %cst_5 = arith.constant dense<0.000000e+00> : vector<128xf32>
    %5 = vector.multi_reduction <add>, %2, %cst_5 [0] : vector<64x128xf32> to vector<128xf32>
    %6 = vector.shape_cast %5 : vector<128xf32> to vector<1x128xf32>
    %7 = vector.shape_cast %6 : vector<1x128xf32> to vector<1x1x128xf32>
    %c0_6 = arith.constant 0 : index
    %c0_7 = arith.constant 0 : index
    %c0_8 = arith.constant 0 : index
    %8 = vector.load %arg4[%c0_6, %c0_7, %c0_8] : memref<1x1x128xf32, #tpu.memory_space<vmem>>, vector<1x1x128xf32>
    tpu.vector_store %arg4[%c0_6, %c0_7, %c0_8], %7 {strides = array<i32>} : memref<1x1x128xf32, #tpu.memory_space<vmem>>, vector<1x1x128xf32>,
    %9 = arith.mulf %2, %2 : vector<64x128xf32>
    %cst_9 = arith.constant dense<0.000000e+00> : vector<128xf32>
    %10 = vector.multi_reduction <add>, %9, %cst_9 [0] : vector<64x128xf32> to vector<128xf32>
    %11 = vector.shape_cast %10 : vector<128xf32> to vector<1x128xf32>
    %12 = vector.shape_cast %11 : vector<1x128xf32> to vector<1x1x128xf32>
    %c0_10 = arith.constant 0 : index
    %c0_11 = arith.constant 0 : index
    %c0_12 = arith.constant 0 : index
    %13 = vector.load %arg5[%c0_10, %c0_11, %c0_12] : memref<1x1x128xf32, #tpu.memory_space<vmem>>, vector<1x1x128xf32>
    tpu.vector_store %arg5[%c0_10, %c0_11, %c0_12], %12 {strides = array<i32>} : memref<1x1x128xf32, #tpu.memory_space<vmem>>, vector<1x1x128xf32>,
    return
  }
  func.func @transform_0(%arg0: i32) -> (i32, i32) {
    %c0_i32 = arith.constant 0 : i32
    %c0_i32_0 = arith.constant 0 : i32
    return %arg0, %c0_i32 : i32, i32
  }
  func.func @transform_1(%arg0: i32) -> (i32, i32) {
    %c0_i32 = arith.constant 0 : i32
    %c0_i32_0 = arith.constant 0 : i32
    %c0_i32_1 = arith.constant 0 : i32
    return %c0_i32, %c0_i32_0 : i32, i32
  }
  func.func @transform_2(%arg0: i32) -> (i32, i32) {
    %c0_i32 = arith.constant 0 : i32
    %c0_i32_0 = arith.constant 0 : i32
    return %arg0, %c0_i32 : i32, i32
  }
  func.func @transform_3(%arg0: i32) -> (i32, i32, i32) {
    %c0_i32 = arith.constant 0 : i32
    %c0_i32_0 = arith.constant 0 : i32
    %c0_i32_1 = arith.constant 0 : i32
    return %arg0, %c0_i32, %c0_i32_0 : i32, i32, i32
  }
  func.func @transform_4(%arg0: i32) -> (i32, i32, i32) {
    %c0_i32 = arith.constant 0 : i32
    %c0_i32_0 = arith.constant 0 : i32
    %c0_i32_1 = arith.constant 0 : i32
    return %arg0, %c0_i32, %c0_i32_0 : i32, i32, i32
  }
}

module attributes {stable_mosaic.version = 11 : i64} {
  func.func @_bn_lrelu_kernel(%arg0: i32, %arg1: memref<64x128xbf16, #tpu.memory_space<vmem>>, %arg2: memref<1x128xf32, #tpu.memory_space<vmem>>, %arg3: memref<1x128xf32, #tpu.memory_space<vmem>>, %arg4: memref<64x128xf32, #tpu.memory_space<vmem>>) attributes {dimension_semantics = [#tpu.dimension_semantics<parallel>], iteration_bounds = array<i64: 2>, scalar_prefetch = 0 : i64, scratch_operands = 0 : i64, tpu.core_type = #tpu.core_type<tc>, window_params = [{transform_indices = @transform_0, window_bounds = array<i64: 64, 128>}, {pipeline_mode = #tpu.pipeline_mode<synchronous>, transform_indices = @transform_1, window_bounds = array<i64: 1, 128>}, {pipeline_mode = #tpu.pipeline_mode<synchronous>, transform_indices = @transform_2, window_bounds = array<i64: 1, 128>}, {transform_indices = @transform_3, window_bounds = array<i64: 64, 128>}]} {
    %c0 = arith.constant 0 : index
    %c0_0 = arith.constant 0 : index
    %0 = vector.load %arg1[%c0, %c0_0] : memref<64x128xbf16, #tpu.memory_space<vmem>>, vector<64x128xbf16>
    %1 = arith.extf %0 : vector<64x128xbf16> to vector<64x128xf32>
    %c0_1 = arith.constant 0 : index
    %c0_2 = arith.constant 0 : index
    %2 = vector.load %arg2[%c0_1, %c0_2] : memref<1x128xf32, #tpu.memory_space<vmem>>, vector<1x128xf32>
    %3 = vector.broadcast %2 : vector<1x128xf32> to vector<64x128xf32>
    %4 = arith.mulf %1, %3 : vector<64x128xf32>
    %c0_3 = arith.constant 0 : index
    %c0_4 = arith.constant 0 : index
    %5 = vector.load %arg3[%c0_3, %c0_4] : memref<1x128xf32, #tpu.memory_space<vmem>>, vector<1x128xf32>
    %6 = vector.broadcast %5 : vector<1x128xf32> to vector<64x128xf32>
    %7 = arith.addf %4, %6 : vector<64x128xf32>
    %cst = arith.constant 0.000000e+00 : f32
    %8 = vector.broadcast %cst : f32 to vector<64x128xf32>
    %9 = arith.cmpf oge, %7, %8 : vector<64x128xf32>
    %cst_5 = arith.constant 2.000000e-01 : f32
    %10 = vector.broadcast %cst_5 : f32 to vector<64x128xf32>
    %11 = arith.mulf %10, %7 : vector<64x128xf32>
    %12 = arith.select %9, %7, %11 : vector<64x128xi1>, vector<64x128xf32>
    %c0_6 = arith.constant 0 : index
    %c0_7 = arith.constant 0 : index
    %13 = vector.load %arg4[%c0_6, %c0_7] : memref<64x128xf32, #tpu.memory_space<vmem>>, vector<64x128xf32>
    tpu.vector_store %arg4[%c0_6, %c0_7], %12 {strides = array<i32>} : memref<64x128xf32, #tpu.memory_space<vmem>>, vector<64x128xf32>,
    return
  }
  func.func @transform_0(%arg0: i32) -> (i32, i32) {
    %c0_i32 = arith.constant 0 : i32
    %c0_i32_0 = arith.constant 0 : i32
    return %arg0, %c0_i32 : i32, i32
  }
  func.func @transform_1(%arg0: i32) -> (i32, i32) {
    %c0_i32 = arith.constant 0 : i32
    %c0_i32_0 = arith.constant 0 : i32
    %c0_i32_1 = arith.constant 0 : i32
    return %c0_i32, %c0_i32_0 : i32, i32
  }
  func.func @transform_2(%arg0: i32) -> (i32, i32) {
    %c0_i32 = arith.constant 0 : i32
    %c0_i32_0 = arith.constant 0 : i32
    %c0_i32_1 = arith.constant 0 : i32
    return %c0_i32, %c0_i32_0 : i32, i32
  }
  func.func @transform_3(%arg0: i32) -> (i32, i32) {
    %c0_i32 = arith.constant 0 : i32
    %c0_i32_0 = arith.constant 0 : i32
    return %arg0, %c0_i32 : i32, i32
  }
}

</mosaic_0001>

<bundles_post_ra>
// kernel: _unet_down_nchw.3
= control target key start
LH: loop header
LB: loop body
LE: loop exit
PB: predicated region body
PF: predicated region fallthrough
CT: control target
= control target key end

     0   :  { %s376_s12 = smov 0   ;;  %s413_s0 = inlined_call_operand.vmem [shape: bf16[128,128], index: 0, kind: input, shape index: {}]   ;;  %s414_s1 = inlined_call_operand.vmem [shape: f32[1,128], index: 1, kind: input, shape index: {}]   ;;  %s415_s2 = inlined_call_operand.vmem [shape: f32[1,128], index: 2, kind: input, shape index: {}]   ;;  %s416_s3 = inlined_call_operand.vmem [shape: f32[128,128], index: 3, kind: output, shape index: {}]  }
   0x1 LB: > { %s308_s13 = sadd.s32 4294967295, %s354_s12   ;;  %p312_p0 = scmp.ge.s32.totalorder %s354_s12, 1  ;;  %s354_s12 = sphi %s376_s12, %s13_s12  }
   0x2   : > { %p138_p1 = scmp.lt.s32.totalorder %s354_s12, 3 }
   0x4   : > { %p139_p2 = pnand %p312_p0, %p138_p1 }
   0x5   : > { %s313_s14 = sshll.u32 (!%p139_p2), %s308_s13, 3  ;;  %v317_v0 = vld [vmem:[%s414_s1] ss:$0 sm:$0xff] (!%p139_p2) }
   0x6   : > { %142 = sbr.rel (%p139_p2) target bundleno = 32 (0x20), region = 32  ;;  %p163_p3 = scmp.lt.s32.totalorder (!%p139_p2), %s313_s14, 15  ;;  %v318_v9 = vld [vmem:[%s415_s2] ss:$0 sm:$0xff] (!%p139_p2) }
   0xd   : > { %s418_s14 = smov (!%p163_p3, %s313_s14), 15 }
   0xe   : > { %s314_s15 = sshll.u32 %s418_s14, 2  ;;  %s316_s23 = sshll.u32 %s418_s14, 3 }
   0xf   : > { %s166_s18 = scalar_lea.vmem %s413_s0, %s314_s15  ;;  %s400_s26 = scalar_lea.vmem %s416_s3, %s316_s23 }
  0x10   : > { %v322_v1 = vld [vmem:[%s166_s18] sm:$0xff]   ;;  %v337_v2 = vld [vmem:[%s166_s18 + $0x8] sm:$0xff]   ;;  %v338_v3 = vld [vmem:[%s166_s18 + $0x10] sm:$0xff]  }
  0x11   : > { %v323_v4 = vunpack.c.l.bf16 %v322_v1  ;;  %v324_v5 = vunpack.c.h.bf16 %v322_v1  ;;  %v327_v6 = vunpack.c.l.bf16 %v337_v2  ;;  %v328_v7 = vunpack.c.h.bf16 %v337_v2  ;;  %v339_v8 = vld [vmem:[%s166_s18 + $0x18] sm:$0xff]  }
  0x12   : > { %v331_v10 = vunpack.c.l.bf16 %v338_v3  ;;  %v332_v11 = vunpack.c.h.bf16 %v338_v3  ;;  %v335_v12 = vunpack.c.l.bf16 %v339_v8  ;;  %v336_v13 = vunpack.c.h.bf16 %v339_v8 }
  0x13   : > { %v197_v14 = vmul.f32 %v323_v4, %v317_v0  ;;  %v198_v15 = vmul.f32 %v324_v5, %v317_v0  ;;  %v199_v16 = vmul.f32 %v327_v6, %v317_v0  ;;  %v200_v17 = vmul.f32 %v328_v7, %v317_v0 }
  0x14   : > { %v201_v18 = vmul.f32 %v331_v10, %v317_v0  ;;  %v202_v19 = vmul.f32 %v332_v11, %v317_v0  ;;  %v203_v20 = vmul.f32 %v335_v12, %v317_v0  ;;  %v204_v21 = vmul.f32 %v336_v13, %v317_v0 }
  0x15   : > { %v212_v22 = vadd.f32 %v318_v9, %v197_v14  ;;  %v213_v23 = vadd.f32 %v318_v9, %v198_v15  ;;  %v214_v24 = vadd.f32 %v318_v9, %v199_v16  ;;  %v215_v25 = vadd.f32 %v318_v9, %v200_v17 }
  0x16   : > { %v216_v26 = vadd.f32 %v318_v9, %v201_v18  ;;  %v217_v27 = vadd.f32 %v318_v9, %v202_v19  ;;  %v218_v28 = vadd.f32 %v318_v9, %v203_v20  ;;  %v219_v29 = vadd.f32 %v318_v9, %v204_v21 }
  0x17   : > { %vm220_vm0 = vcmp.ge.f32.partialorder %v212_v22, 0.0  ;;  %v228_v30 = vmul.f32 0.2, %v212_v22  ;;  %vm221_vm1 = vcmp.ge.f32.partialorder %v213_v23, 0.0  ;;  %v229_v31 = vmul.f32 0.2, %v213_v23 }
  0x18   : > { %vm222_vm2 = vcmp.ge.f32.partialorder %v214_v24, 0.0  ;;  %v230_v32 = vmul.f32 0.2, %v214_v24  ;;  %vm223_vm3 = vcmp.ge.f32.partialorder %v215_v25, 0.0  ;;  %v231_v33 = vmul.f32 0.2, %v215_v25 }
  0x19   : > { %v236_v34 = vsel %vm220_vm0, %v212_v22, %v228_v30  ;;  %v237_v35 = vsel %vm221_vm1, %v213_v23, %v229_v31  ;;  %vm224_vm4 = vcmp.ge.f32.partialorder %v216_v26, 0.0  ;;  %v232_v36 = vmul.f32 0.2, %v216_v26 }
  0x1a   : > { %244 = vst [vmem:[%s400_s26] sm:$0xff] %v236_v34  ;;  %245 = vst [vmem:[%s400_s26 + $0x8] sm:$0xff] %v237_v35  ;;  %v238_v37 = vsel %vm222_vm2, %v214_v24, %v230_v32  ;;  %v239_v38 = vsel %vm223_vm3, %v215_v25, %v231_v33  ;;  %vm225_vm5 = vcmp.ge.f32.partialorder %v217_v27, 0.0  ;;  %v233_v39 = vmul.f32 0.2, %v217_v27 }
  0x1b   : > { %246 = vst [vmem:[%s400_s26 + $0x10] sm:$0xff] %v238_v37  ;;  %247 = vst [vmem:[%s400_s26 + $0x18] sm:$0xff] %v239_v38  ;;  %v240_v40 = vsel %vm224_vm4, %v216_v26, %v232_v36  ;;  %vm226_vm6 = vcmp.ge.f32.partialorder %v218_v28, 0.0  ;;  %v234_v41 = vmul.f32 0.2, %v218_v28  ;;  %vm227_vm7 = vcmp.ge.f32.partialorder %v219_v29, 0.0 }
  0x1c   : > { %248 = vst [vmem:[%s400_s26 + $0x20] sm:$0xff] %v240_v40  ;;  %v241_v42 = vsel %vm225_vm5, %v217_v27, %v233_v39  ;;  %v235_v43 = vmul.f32 0.2, %v219_v29 }
  0x1d   : > { %249 = vst [vmem:[%s400_s26 + $0x28] sm:$0xff] %v241_v42  ;;  %v242_v44 = vsel %vm226_vm6, %v218_v28, %v234_v41 }
  0x1e   : > { %250 = vst [vmem:[%s400_s26 + $0x30] sm:$0xff] %v242_v44  ;;  %v243_v45 = vsel %vm227_vm7, %v219_v29, %v235_v43 }
  0x1f   : > { %251 = vst [vmem:[%s400_s26 + $0x38] sm:$0xff] %v243_v45 }
  0x20 PF: > { %s13_s12 = sadd.s32 1, %s354_s12  }
  0x21   : > { %p10_p4 = scmp.ge.s32.totalorder %s13_s12, 4  }
  0x23   :  { %12 = sbr.rel (!%p10_p4) target bundleno = 1 (0x1), region = 62 }

// kernel: _unet_down_nchw.2
= control target key start
LH: loop header
LB: loop body
LE: loop exit
PB: predicated region body
PF: predicated region fallthrough
CT: control target
= control target key end

     0   :  { %s682_s15 = smov 0   ;;  %s729_s0 = inlined_call_operand.vmem [shape: bf16[128,64], index: 0, kind: input, shape index: {}]   ;;  %s730_s1 = inlined_call_operand.vmem [shape: bf16[64,128], index: 1, kind: input, shape index: {}]   ;;  %s731_s2 = inlined_call_operand.vmem [shape: bf16[128,128], index: 2, kind: output, shape index: {0}]   ;;  %s732_s3 = inlined_call_operand.vmem [shape: f32[2,1,128], index: 3, kind: output, shape index: {1}]   ;;  %s733_s4 = inlined_call_operand.vmem [shape: f32[2,1,128], index: 4, kind: output, shape index: {2}]  }
   0x1 LB: > { %s688_s16 = sadd.s32 4294967295, %s655_s15   ;;  %p543_p0 = scmp.ge.s32.totalorder %s655_s15, 1  ;;  %s655_s15 = sphi %s682_s15, %s15_s15  }
   0x2   : > { %p168_p1 = scmp.lt.s32.totalorder %s655_s15, 3 }
   0x4   : > { %p169_p2 = pnand %p543_p0, %p168_p1 }
   0x5   : > { %v641_v0 = vld [vmem:[%s730_s1] sm:$0xff] (!%p169_p2)   ;;  %s544_s19 = sshll.u32 (!%p169_p2), %s688_s16, 3  ;;  %v642_v1 = vld [vmem:[%s730_s1 + $0x8] sm:$0xff] (!%p169_p2)   ;;  %v643_v2 = vld [vmem:[%s730_s1 + $0x10] sm:$0xff] (!%p169_p2)   ;;  %vm279_vm0 = vcmask (!%p169_p2), 523264   ;;  %p212_p4 = scmp.lt.s32.totalorder (!%p169_p2), %s688_s16, 1 }
   0x6   : > { %172 = sbr.rel (%p169_p2) target bundleno = 266 (0x10a), region = 28  ;;  %p201_p3 = scmp.lt.s32.totalorder (!%p169_p2), %s544_s19, 15  ;;  %609 = vmatprep.subr.bf16.mxu0 (!%p169_p2), %v641_v0  ;;  %625 = vmatprep.subr.bf16.mxu1 (!%p169_p2), %v641_v0  ;;  %v644_v4 = vld [vmem:[%s730_s1 + $0x18] sm:$0xff] (!%p169_p2)  }
   0x7   : > { %610 = vmatpush3.bf16.msra.mxu0 (!%p169_p2), %v641_v0  ;;  %629 = vmatpush3.bf16.msra.mxu1 (!%p169_p2), %v641_v0 }
   0x8   : > { %611 = vmatprep.subr.bf16.mxu0 (!%p169_p2), %v642_v1  ;;  %626 = vmatprep.subr.bf16.mxu1 (!%p169_p2), %v642_v1 }
   0xb   : > { %612 = vmatpush3.bf16.msra.mxu0 (!%p169_p2), %v642_v1  ;;  %630 = vmatpush3.bf16.msra.mxu1 (!%p169_p2), %v642_v1 }
   0xc   : > { %613 = vmatprep.subr.bf16.mxu0 (!%p169_p2), %v643_v2  ;;  %627 = vmatprep.subr.bf16.mxu1 (!%p169_p2), %v643_v2 }
   0xd   : > { %s735_s19 = smov (!%p201_p3, %s544_s19), 15  ;;  %s737_s16 = smov (!%p212_p4, %s688_s16), 1 }
   0xe   : > { %s545_s24 = sshll.u32 %s735_s19, 2  ;;  %s214_s9 = scalar_lea.vmem %s732_s3, %s737_s16 }
   0xf   : > { %s204_s27 = scalar_lea.vmem %s729_s0, %s545_s24  ;;  %614 = vmatpush3.bf16.msra.mxu0 %v643_v2  ;;  %631 = vmatpush3.bf16.msra.mxu1 %v643_v2  ;;  %s210_s6 = scalar_lea.vmem %s731_s2, %s545_s24 }
  0x10   : > { %v645_v3 = vld [vmem:[%s204_s27] sm:$0xff]   ;;  %v647_v5 = vld [vmem:[%s204_s27 + $0x10] sm:$0xff]   ;;  %615 = vmatprep.subr.bf16.mxu0 %v644_v4  ;;  %628 = vmatprep.subr.bf16.mxu1 %v644_v4  ;;  %v646_v6 = vld [vmem:[%s204_s27 + $0x8] sm:$0xff]   ;;  %s217_s12 = scalar_lea.vmem %s733_s4, %s737_s16 }
  0x11   : > { %617 = vmatprep.mubr.msk.bf16.mxu0 %vm279_vm0, %v645_v3  ;;  %621 = vmatprep.mubr.msk.bf16.mxu1 %vm279_vm0, %v647_v5  ;;  %v648_v7 = vld [vmem:[%s204_s27 + $0x18] sm:$0xff]  }
  0x13   : > { %616 = vmatpush3.bf16.msra.mxu0 %v644_v4  ;;  %632 = vmatpush3.bf16.msra.mxu1 %v644_v4 }
  0x16   : > { %618 = vmatmul.mubr.msk.bf16.vlgmr.msra.gmra.mrb[0].mxu0 %vm279_vm0, %v646_v6  ;;  %622 = vmatmul.mubr.msk.bf16.vlgmr.msra.gmra.mrb[0].mxu1 %vm279_vm0, %v648_v7 }
  0xe9   : > { %v619_v8 = vpop.f32.mrb[0].mxu0  ;;  %v623_v9 = vpop.f32.mrb[0].mxu1 }
  0xea   : > { %v326_v10 = vpop.f32.mrb[1].mxu0  ;;  %v342_v11 = vpop.f32.mrb[1].mxu1  ;;  %v413_v23 = vmul.f32 %v619_v8, %v619_v8  ;;  %v417_v35 = vmul.f32 %v623_v9, %v623_v9 }
  0xeb   : > { %v620_v12 = vpop.f32.mrb[2].mxu0  ;;  %v624_v13 = vpop.f32.mrb[2].mxu1  ;;  %v411_v14 = vmul.f32 %v326_v10, %v326_v10  ;;  %v415_v29 = vmul.f32 %v342_v11, %v342_v11 }
  0xec   : > { %v586_v15 = vpack.c.bf16 %v620_v12, %v619_v8  ;;  %v329_v16 = vpop.f32.mrb[3].mxu0  ;;  %v596_v17 = vpack.c.bf16 %v624_v13, %v623_v9  ;;  %v345_v18 = vpop.f32.mrb[3].mxu1  ;;  %v414_v26 = vmul.f32 %v620_v12, %v620_v12  ;;  %v418_v38 = vmul.f32 %v624_v13, %v624_v13 }
  0xed   : > { %v581_v19 = vpack.c.bf16 %v329_v16, %v326_v10  ;;  %v397_v20 = vadd.f32 %v329_v16, %v326_v10  ;;  %v412_v21 = vmul.f32 %v329_v16, %v329_v16  ;;  %v591_v22 = vpack.c.bf16 %v345_v18, %v342_v11 }
  0xee   : > { %598 = vst [vmem:[%s210_s6 + $0x8] sm:$0xff] %v586_v15   ;;  %600 = vst [vmem:[%s210_s6 + $0x18] sm:$0xff] %v596_v17   ;;  %v416_v34 = vmul.f32 %v345_v18, %v345_v18 }
  0xef   : > { %582 = vst [vmem:[%s210_s6] sm:$0xff] %v581_v19   ;;  %v398_v24 = vadd.f32 %v619_v8, %v397_v20  ;;  %v419_v25 = vadd.f32 %v412_v21, %v411_v14  ;;  %599 = vst [vmem:[%s210_s6 + $0x10] sm:$0xff] %v591_v22  }
  0xf1   : > { %v420_v27 = vadd.f32 %v419_v25, %v413_v23  ;;  %v399_v28 = vadd.f32 %v620_v12, %v398_v24 }
  0xf3   : > { %v400_v30 = vadd.f32 %v399_v28, %v342_v11  ;;  %v421_v31 = vadd.f32 %v420_v27, %v414_v26 }
  0xf5   : > { %v422_v32 = vadd.f32 %v421_v31, %v415_v29  ;;  %v401_v33 = vadd.f32 %v400_v30, %v345_v18 }
  0xf7   : > { %v402_v36 = vadd.f32 %v623_v9, %v401_v33  ;;  %v423_v37 = vadd.f32 %v422_v32, %v416_v34 }
  0xf9   : > { %v403_v39 = vadd.f32 %v624_v13, %v402_v36  ;;  %v424_v40 = vadd.f32 %v423_v37, %v417_v35 }
  0xfb   : > { %v404_v41 = vrot.slane %v403_v39, 4  ;;  %v425_v42 = vadd.f32 %v424_v40, %v418_v38 }
  0xfd   : > { %v405_v43 = vadd.f32 %v404_v41, %v403_v39  ;;  %v426_v44 = vrot.slane %v425_v42, 4 }
  0xff   : > { %v406_v45 = vrot.slane %v405_v43, 2  ;;  %v427_v46 = vadd.f32 %v426_v44, %v425_v42 }
 0x101   : > { %v407_v47 = vadd.f32 %v406_v45, %v405_v43  ;;  %v428_v48 = vrot.slane %v427_v46, 2 }
 0x103   : > { %v408_v49 = vrot.slane %v407_v47, 1  ;;  %v429_v50 = vadd.f32 %v428_v48, %v427_v46 }
 0x105   : > { %v409_v51 = vadd.f32 %v408_v49, %v407_v47  ;;  %v430_v52 = vrot.slane %v429_v50, 1 }
 0x107   : > { %410 = vst [vmem:[%s214_s9] sm:$0x1] %v409_v51  ;;  %v431_v53 = vadd.f32 %v430_v52, %v429_v50 }
 0x109   : > { %432 = vst [vmem:[%s217_s12] sm:$0x1] %v431_v53 }
 0x10a PF: > { %s15_s15 = sadd.s32 1, %s655_s15  }
 0x10b   : > { %p12_p5 = scmp.ge.s32.totalorder %s15_s15, 4  }
 0x10d   :  { %14 = sbr.rel (!%p12_p5) target bundleno = 1 (0x1), region = 82 }

</bundles_post_ra>
